<compile_context>
chip_gen: v6e
topology: v6e:2x2x1
jax: 0.10.0
libtpu: 0.0.40
codegen_flags: <defaults>
</compile_context>

<pallas_src>
from functools import partial

import numpy as np
import jax
import jax.numpy as jnp
from jax.experimental import pallas as pl
from jax.experimental.pallas import tpu as pltpu


# ----------------------------- Pallas kernel --------------------------------
def vgmf_kernel(sv_ref, kv_ref, w_ref, b_ref, out_ref):
    sv = sv_ref[...]                                    # (TB, D) f32
    kv = kv_ref[...]                                    # (TB, D) f32
    D = sv.shape[-1]
    eps = jnp.float32(1e-8)

    # l2norm: norm = sqrt(sum(x^2)) + eps ; x * (1 / norm).
    # The approximate reciprocal lands on the EUP slot (otherwise idle here),
    # keeping the eps-in-denominator semantics of the reference.
    sv_inv = pl.reciprocal(
        jnp.sqrt(jnp.sum(sv * sv, axis=-1, keepdims=True)) + eps, approx=True)
    kv_inv = pl.reciprocal(
        jnp.sqrt(jnp.sum(kv * kv, axis=-1, keepdims=True)) + eps, approx=True)
    sv_n = sv * sv_inv
    kv_n = kv * kv_inv

    # Gate Linear(2D, E) on cat([sv_n, kv_n]) without materializing the
    # concat: two MXU matmuls against the halves of the fused (2D, E) weight,
    # bf16 operands, f32 accumulation.
    w = w_ref[...]                                      # (2D, E) bf16
    logits = (
        jnp.dot(sv_n.astype(w.dtype), w[:D, :],
                preferred_element_type=jnp.float32)
        + jnp.dot(kv_n.astype(w.dtype), w[D:, :],
                  preferred_element_type=jnp.float32)
        + b_ref[...]
    )                                                   # (TB, E) f32
    sw = jax.nn.sigmoid(logits)

    # sw * sv_n + (1 - sw) * kv_n  ==  kv_n + sw * (sv_n - kv_n)
    out_ref[...] = kv_n + sw * (sv_n - kv_n)


# ------------------------------ wrappers --------------------------------------
def prepare_gate_params(gate_w, gate_b):
    """One-time preprocessing of the nn.Linear(1024, E) gate parameters.

    Call ONCE at model setup (not per forward call) so the transpose / bf16
    cast does not add un-hidden HBM traffic on every step.

    Returns:
      w_cat: (2D, E) bf16  -- [W_s; W_k] stacked along the contraction axis
      b:     (1, E)  f32
    """
    E, twoD = gate_w.shape
    w_cat = jnp.asarray(gate_w, jnp.float32).T.astype(jnp.bfloat16)   # (2D, E)
    b = jnp.asarray(gate_b, jnp.float32).reshape(1, E)
    return w_cat, b


@partial(jax.jit, static_argnames=("block_b",))
def vgmf_forward(sv, kv, w_cat, b, *, block_b=1024):
    """Fused VGMF forward.  sv, kv: (B, D) f32.  Returns (B, D) f32."""
    B, D = sv.shape
    twoD, E = w_cat.shape
    assert twoD == 2 * D and E == D, \
        "VGMF_Fusion requires feature dim 512 and embed_dim == 512"

    if B <= block_b:
        # Small batch: single grid step.  Block == full array, so no (8,128)
        # padding is needed and the ~0.35 us per-step overhead is paid once.
        tb, pad = B, 0
    else:
        # Large batch: tile the batch (TB multiple of 8), pad B up to a
        # multiple of the tile.  Padded rows normalize to 0 and are sliced off.
        tb = block_b
        pad = (-B) % tb
        if pad:
            sv = jnp.pad(sv, ((0, pad), (0, 0)))
            kv = jnp.pad(kv, ((0, pad), (0, 0)))
    grid_b = (B + pad) // tb

    out = pl.pallas_call(
        vgmf_kernel,
        out_shape=jax.ShapeDtypeStruct((B + pad, E), jnp.float32),
        grid_spec=pltpu.PrefetchScalarGridSpec(
            num_scalar_prefetch=0,
            grid=(grid_b,),
            in_specs=[
                pl.BlockSpec((tb, D), lambda i: (i, 0)),      # sv tile
                pl.BlockSpec((tb, D), lambda i: (i, 0)),      # kv tile
                pl.BlockSpec((2 * D, E), lambda i: (0, 0)),   # fused weight (resident)
                pl.BlockSpec((1, E), lambda i: (0, 0)),       # bias (resident)
            ],
            out_specs=pl.BlockSpec((tb, E), lambda i: (i, 0)),
        ),
        compiler_params=pltpu.CompilerParams(
            # Batch tiles are independent -> shard the axis across TensorCores.
            dimension_semantics=("parallel",),
            # Explicit scoped-VMEM budget: ~14 MiB peak at TB=1024 (double-
            # buffered f32 sv/kv/out tiles + 1 MiB bf16 resident weight);
            # safe on v5e/v6e (128 MiB) and v7x (64 MiB physical).
            vmem_limit_bytes=32 * 1024 * 1024,
        ),
    )(sv, kv, w_cat, b)

    return out[:B] if pad else out


# ----------------------- pure-JAX reference (torch semantics) ----------------
def reference(sv, kv, gate_w, gate_b):
    def l2norm(x):
        n = jnp.sqrt(jnp.sum(x * x, axis=-1, keepdims=True)) + 1e-8
        return x / n

    sv_n = l2norm(sv)
    kv_n = l2norm(kv)
    logits = jnp.dot(jnp.concatenate([sv_n, kv_n], axis=-1), gate_w.T,
                     precision=jax.lax.Precision.HIGHEST) + gate_b
    sw = jax.nn.sigmoid(logits)
    return sw * sv_n + (1.0 - sw) * kv_n


# ---------------------------------- main --------------------------------------
if __name__ == "__main__":
    B = 2
    D = 512   # gate in_features = 1024 is hard-coded -> each input is 512-dim
    E = 512   # embed_dim must equal 512 for the elementwise blend

    key = jax.random.PRNGKey(0)
    k1, k2, k3, k4 = jax.random.split(key, 4)
    sv = jax.random.normal(k1, (B, D), jnp.float32)
    kv = jax.random.normal(k2, (B, D), jnp.float32)
    gate_w = jax.random.normal(k3, (E, 2 * D), jnp.float32) * 0.05
    gate_b = jax.random.normal(k4, (E,), jnp.float32) * 0.05

    # One-time parameter preprocessing (hoisted out of the per-call path).
    w_cat, b = prepare_gate_params(gate_w, gate_b)
    w_cat, b = jax.block_until_ready((w_cat, b))

    out = vgmf_forward(sv, kv, w_cat, b)
    out = jax.block_until_ready(out)

    ref = reference(sv, kv, gate_w, gate_b)
    np.testing.assert_allclose(np.asarray(out), np.asarray(ref),
                               rtol=2e-3, atol=2e-3)
    print("KERNEL_OK")
</pallas_src>

<mosaic_0001>
module attributes {stable_mosaic.version = 11 : i64} {
  func.func @vgmf_kernel(%arg0: i32, %arg1: memref<2x512xf32, #tpu.memory_space<vmem>>, %arg2: memref<2x512xf32, #tpu.memory_space<vmem>>, %arg3: memref<1024x512xbf16, #tpu.memory_space<vmem>>, %arg4: memref<1x512xf32, #tpu.memory_space<vmem>>, %arg5: memref<2x512xf32, #tpu.memory_space<vmem>>) attributes {dimension_semantics = [#tpu.dimension_semantics<parallel>], iteration_bounds = array<i64: 1>, scalar_prefetch = 0 : i64, scratch_operands = 0 : i64, tpu.core_type = #tpu.core_type<tc>, window_params = [{transform_indices = @transform_0, window_bounds = array<i64: 2, 512>}, {transform_indices = @transform_1, window_bounds = array<i64: 2, 512>}, {pipeline_mode = #tpu.pipeline_mode<synchronous>, transform_indices = @transform_2, window_bounds = array<i64: 1024, 512>}, {pipeline_mode = #tpu.pipeline_mode<synchronous>, transform_indices = @transform_3, window_bounds = array<i64: 1, 512>}, {transform_indices = @transform_4, window_bounds = array<i64: 2, 512>}]} {
    %c0 = arith.constant 0 : index
    %c0_0 = arith.constant 0 : index
    %0 = vector.load %arg1[%c0, %c0_0] : memref<2x512xf32, #tpu.memory_space<vmem>>, vector<2x512xf32>
    %c0_1 = arith.constant 0 : index
    %c0_2 = arith.constant 0 : index
    %1 = vector.load %arg2[%c0_1, %c0_2] : memref<2x512xf32, #tpu.memory_space<vmem>>, vector<2x512xf32>
    %2 = arith.mulf %0, %0 : vector<2x512xf32>
    %cst = arith.constant dense<0.000000e+00> : vector<2xf32>
    %3 = vector.multi_reduction <add>, %2, %cst [1] : vector<2x512xf32> to vector<2xf32>
    %4 = vector.shape_cast %3 : vector<2xf32> to vector<2x1xf32>
    %5 = math.sqrt %4 : vector<2x1xf32>
    %cst_3 = arith.constant 9.99999993E-9 : f32
    %6 = vector.broadcast %cst_3 : f32 to vector<2x1xf32>
    %7 = arith.addf %5, %6 : vector<2x1xf32>
    %8 = tpu.reciprocal %7 {approx = true} : vector<2x1xf32> -> vector<2x1xf32>
    %9 = arith.mulf %1, %1 : vector<2x512xf32>
    %cst_4 = arith.constant dense<0.000000e+00> : vector<2xf32>
    %10 = vector.multi_reduction <add>, %9, %cst_4 [1] : vector<2x512xf32> to vector<2xf32>
    %11 = vector.shape_cast %10 : vector<2xf32> to vector<2x1xf32>
    %12 = math.sqrt %11 : vector<2x1xf32>
    %cst_5 = arith.constant 9.99999993E-9 : f32
    %13 = vector.broadcast %cst_5 : f32 to vector<2x1xf32>
    %14 = arith.addf %12, %13 : vector<2x1xf32>
    %15 = tpu.reciprocal %14 {approx = true} : vector<2x1xf32> -> vector<2x1xf32>
    %16 = vector.broadcast %8 : vector<2x1xf32> to vector<2x512xf32>
    %17 = arith.mulf %0, %16 : vector<2x512xf32>
    %18 = vector.broadcast %15 : vector<2x1xf32> to vector<2x512xf32>
    %19 = arith.mulf %1, %18 : vector<2x512xf32>
    %c0_6 = arith.constant 0 : index
    %c0_7 = arith.constant 0 : index
    %20 = vector.load %arg3[%c0_6, %c0_7] : memref<1024x512xbf16, #tpu.memory_space<vmem>>, vector<1024x512xbf16>
    %21 = arith.truncf %17 : vector<2x512xf32> to vector<2x512xbf16>
    %22 = vector.extract_strided_slice %20 {offsets = [0, 0], sizes = [512, 512], strides = [1, 1]} : vector<1024x512xbf16> to vector<512x512xbf16>
    %cst_8 = arith.constant dense<0.000000e+00> : vector<2x512xf32>
    %23 = tpu.matmul %21, %22, %cst_8 {dimension_numbers = #tpu.dot_dimension_numbers<[1], [0], [0], [1], [0, 0, 1, 1], [], []>} : vector<2x512xbf16>, vector<512x512xbf16>, vector<2x512xf32> -> vector<2x512xf32>
    %24 = arith.truncf %19 : vector<2x512xf32> to vector<2x512xbf16>
    %25 = vector.extract_strided_slice %20 {offsets = [512, 0], sizes = [512, 512], strides = [1, 1]} : vector<1024x512xbf16> to vector<512x512xbf16>
    %cst_9 = arith.constant dense<0.000000e+00> : vector<2x512xf32>
    %26 = tpu.matmul %24, %25, %cst_9 {dimension_numbers = #tpu.dot_dimension_numbers<[1], [0], [0], [1], [0, 0, 1, 1], [], []>} : vector<2x512xbf16>, vector<512x512xbf16>, vector<2x512xf32> -> vector<2x512xf32>
    %27 = arith.addf %23, %26 : vector<2x512xf32>
    %c0_10 = arith.constant 0 : index
    %c0_11 = arith.constant 0 : index
    %28 = vector.load %arg4[%c0_10, %c0_11] : memref<1x512xf32, #tpu.memory_space<vmem>>, vector<1x512xf32>
    %29 = vector.broadcast %28 : vector<1x512xf32> to vector<2x512xf32>
    %30 = arith.addf %27, %29 : vector<2x512xf32>
    %31 = arith.negf %30 : vector<2x512xf32>
    %32 = math.exp %31 : vector<2x512xf32>
    %cst_12 = arith.constant 1.000000e+00 : f32
    %33 = vector.broadcast %cst_12 : f32 to vector<2x512xf32>
    %34 = arith.addf %33, %32 : vector<2x512xf32>
    %35 = arith.divf %33, %34 : vector<2x512xf32>
    %36 = arith.subf %17, %19 : vector<2x512xf32>
    %37 = arith.mulf %35, %36 : vector<2x512xf32>
    %38 = arith.addf %19, %37 : vector<2x512xf32>
    %c0_13 = arith.constant 0 : index
    %c0_14 = arith.constant 0 : index
    %39 = vector.load %arg5[%c0_13, %c0_14] : memref<2x512xf32, #tpu.memory_space<vmem>>, vector<2x512xf32>
    tpu.vector_store %arg5[%c0_13, %c0_14], %38 {strides = array<i32>} : memref<2x512xf32, #tpu.memory_space<vmem>>, vector<2x512xf32>,
    return
  }
  func.func @transform_0(%arg0: i32) -> (i32, i32) {
    %c0_i32 = arith.constant 0 : i32
    %c0_i32_0 = arith.constant 0 : i32
    return %arg0, %c0_i32 : i32, i32
  }
  func.func @transform_1(%arg0: i32) -> (i32, i32) {
    %c0_i32 = arith.constant 0 : i32
    %c0_i32_0 = arith.constant 0 : i32
    return %arg0, %c0_i32 : i32, i32
  }
  func.func @transform_2(%arg0: i32) -> (i32, i32) {
    %c0_i32 = arith.constant 0 : i32
    %c0_i32_0 = arith.constant 0 : i32
    %c0_i32_1 = arith.constant 0 : i32
    return %c0_i32, %c0_i32_0 : i32, i32
  }
  func.func @transform_3(%arg0: i32) -> (i32, i32) {
    %c0_i32 = arith.constant 0 : i32
    %c0_i32_0 = arith.constant 0 : i32
    %c0_i32_1 = arith.constant 0 : i32
    return %c0_i32, %c0_i32_0 : i32, i32
  }
  func.func @transform_4(%arg0: i32) -> (i32, i32) {
    %c0_i32 = arith.constant 0 : i32
    %c0_i32_0 = arith.constant 0 : i32
    return %arg0, %c0_i32 : i32, i32
  }
}

</mosaic_0001>

<bundles_post_ra>
// kernel: vgmf_forward.1
= control target key start
LH: loop header
LB: loop body
LE: loop exit
PB: predicated region body
PF: predicated region fallthrough
CT: control target
= control target key end

     0   :  { %9 = vsyncpa [#allocation3], 0  ;;  %s3100_s0 = inlined_call_operand.hbm [shape: f32[2,512], index: 0, kind: input, shape index: {}]   ;;  %s3101_s1 = inlined_call_operand.hbm [shape: f32[2,512], index: 1, kind: input, shape index: {}]   ;;  %s3102_s2 = inlined_call_operand.hbm [shape: bf16[1024,512], index: 2, kind: input, shape index: {}]   ;;  %s3103_s3 = inlined_call_operand.vmem [shape: f32[1,512], index: 3, kind: input, shape index: {}]   ;;  %s3104_s4 = inlined_call_operand.hbm [shape: f32[2,512], index: 4, kind: output, shape index: {}]  }
   0x1   :  { %10 = vsyncpa [#allocation6], 0 }
   0x2   :  { %11 = vsyncpa [#allocation4], 0  ;;  %s2956_s15 = smov [#allocation5]   ;;  %s2957_s17 = smov [#allocation2]  }
   0x3   :  { %s28_s16 = sshll.u32 %s2956_s15, 4  ;;  %s18_s18 = sshll.u32 %s2957_s17, 4  ;;  %s29_s16 = int_to_ptr.vmem [resolvable:$true] %s28_s16  ;;  %s19_s18 = int_to_ptr.vmem [resolvable:$true] %s18_s18 }
   0x4   :  { %s2878_s19 = scalar_lea.vmem %s29_s16, 128  ;;  %p2883_p1 = scmp.lt.s32.totalorder %s29_s16, %s29_s16 }
   0x5   :  { %p2879_p0 = scmp.ne.s32.totalorder %s29_s16, %s2878_s19  ;;  %p2884_p2 = scmp.lt.s32.totalorder %s2878_s19, %s2878_s19 }
   0x7   :  { %p2885_p3 = por %p2884_p2, %p2883_p1 }
   0x9   :  { %p2886_p4 = pnand %p2885_p3, %p2879_p0 }
   0xb   :  { %2889 = shalt.err (!%p2886_p4)
}
   0xc   :  { %31 = dma.hbm_to_vmem [thread:$0]  %s3101_s1, 128, %s29_s16, [#allocation6]  }
   0xd   :  { %s2898_s22 = scalar_lea.vmem %s19_s18, 128  ;;  %p2903_p6 = scmp.lt.s32.totalorder %s19_s18, %s19_s18 }
   0xe   :  { %p2899_p5 = scmp.ne.s32.totalorder %s19_s18, %s2898_s22  ;;  %p2904_p7 = scmp.lt.s32.totalorder %s2898_s22, %s2898_s22 }
  0x10   :  { %p2905_p8 = por %p2904_p7, %p2903_p6 }
  0x12   :  { %p2906_p9 = pnand %p2905_p8, %p2899_p5 }
  0x14   :  { %2909 = shalt.err (!%p2906_p9)
}
  0x15   :  { %21 = dma.hbm_to_vmem [thread:$0]  %s3100_s0, 128, %s19_s18, [#allocation3]  }
  0x16   :  { %s2958_s25 = smov [#allocation7]  }
  0x17   :  { %s37_s26 = sshll.u32 %s2958_s25, 4  ;;  %s38_s26 = int_to_ptr.vmem [resolvable:$true] %s37_s26 }
  0x18   :  { %s2918_s27 = scalar_lea.vmem %s38_s26, 32768  ;;  %p2923_p11 = scmp.lt.s32.totalorder %s38_s26, %s38_s26 }
  0x19   :  { %p2919_p10 = scmp.ne.s32.totalorder %s38_s26, %s2918_s27  ;;  %p2924_p12 = scmp.lt.s32.totalorder %s2918_s27, %s2918_s27 }
  0x1b   :  { %p2925_p13 = por %p2924_p12, %p2923_p11 }
  0x1d   :  { %p2926_p0 = pnand %p2925_p13, %p2919_p10 }
  0x1f   :  { %2929 = shalt.err (!%p2926_p0)
}
  0x20   :  { %s2959_s1 = smov 256   ;;  %s2960_s28 = smov 16  }
  0x21   :  { %43 = dma.hbm_to_vmem [thread:$0]  %s3102_s2, 32768, %s38_s26, [#allocation6], %s2959_s1, %s2959_s1, %s2960_s28  }
  0x22   :  { %2950 = dma.done.wait [#allocation3], 128  }
  0x23   :  { %2951 = vsyncadd [#allocation3], 4294967168 }
  0x24   :  { %2952 = dma.done.wait [#allocation6], 32896  }
  0x25   :  { %2953 = vsyncadd [#allocation6], 4294934400  ;;  %v63_v0 = vlaneseq  ;;  %v2961_v1 = vmov 1983009808   ;;  %v3003_v6 = vld [vmem:[#allocation5] sm:$0xff]  ;;  %v55_v7 = vld [vmem:[#allocation2] sm:$0xff] }
  0x26   :  { %v61_v2 = vunpack.c.l.s4 %v2961_v1  ;;  %v99_v8 = vmul.f32 %v3003_v6, %v3003_v6  ;;  %v57_v9 = vmul.f32 %v55_v7, %v55_v7  ;;  %v2461_v10 = vld [vmem:[#allocation7 + $0x4e4] ss:$16 sps:$4 sm:$0xff]   ;;  %v2463_v11 = vld [vmem:[#allocation7 + $0x4e0] ss:$16 sps:$4 sm:$0xff]   ;;  %vm80_vm0 = vcmask 1041408  }
  0x27   :  { %v2998_v3 = vshrl.u32 %v63_v0, 7  ;;  %v2464_v12 = vld [vmem:[#allocation7 + $0x6e4] ss:$16 sps:$4 sm:$0xff]   ;;  %1108 = vmatprep.subr.bf16.mxu0 %v2461_v10  ;;  %v2466_v17 = vld [vmem:[#allocation7 + $0x6e0] ss:$16 sps:$4 sm:$0xff]  }
  0x28   :  { %v62_v4 = vunpack.c.0.s8 %v61_v2  ;;  %v101_v13 = vcombine.high %v99_v8, %v99_v8  ;;  %v59_v15 = vcombine.high %v57_v9, %v57_v9  ;;  %1109 = vmatpush1.bf16.msra.mxu0 %v2463_v11  ;;  %1149 = vmatprep.subr.bf16.mxu1 %v2464_v12  ;;  %v2467_v18 = vld [vmem:[#allocation7 + $0x4c4] ss:$16 sps:$4 sm:$0xff]   ;;  %v2469_v19 = vld [vmem:[#allocation7 + $0x4c0] ss:$16 sps:$4 sm:$0xff]  }
  0x29   :  { %1150 = vmatpush1.bf16.msra.mxu1 %v2466_v17  ;;  %v2470_v24 = vld [vmem:[#allocation7 + $0x6c4] ss:$16 sps:$4 sm:$0xff]   ;;  %v2472_v25 = vld [vmem:[#allocation7 + $0x6c0] ss:$16 sps:$4 sm:$0xff]   ;;  %1110 = vmatprep.subr.bf16.mxu0 %v2467_v18 }
  0x2a   :  { %v3001_v5 = vsub.s32 %v62_v4, %v2998_v3  ;;  %v2473_v28 = vld [vmem:[#allocation7 + $0x4a4] ss:$16 sps:$4 sm:$0xff]   ;;  %1151 = vmatprep.subr.bf16.mxu1 %v2470_v24  ;;  %v2475_v33 = vld [vmem:[#allocation7 + $0x4a0] ss:$16 sps:$4 sm:$0xff]  }
  0x2b   :  { %v2476_v37 = vld [vmem:[#allocation7 + $0x6a4] ss:$16 sps:$4 sm:$0xff]   ;;  %v2478_v38 = vld [vmem:[#allocation7 + $0x6a0] ss:$16 sps:$4 sm:$0xff]  }
  0x2c   :  { %v108_v14 = vrot.slane %v99_v8, %v3001_v5  ;;  %v66_v16 = vrot.slane %v57_v9, %v3001_v5  ;;  %v115_v20 = vrot.slane %v101_v13, %v3001_v5  ;;  %v73_v23 = vrot.slane %v59_v15, %v3001_v5  ;;  %1111 = vmatpush1.bf16.msra.mxu0 %v2469_v19  ;;  %v2479_v41 = vld [vmem:[#allocation7 + $0x484] ss:$16 sps:$4 sm:$0xff]   ;;  %v2481_v47 = vld [vmem:[#allocation7 + $0x480] ss:$16 sps:$4 sm:$0xff]  }
  0x2d   :  { %1152 = vmatpush1.bf16.msra.mxu1 %v2472_v25  ;;  %1112 = vmatprep.subr.bf16.mxu0 %v2473_v28  ;;  %v2482_v45 = vld [vmem:[#allocation7 + $0x684] ss:$16 sps:$4 sm:$0xff]   ;;  %v2484_v48 = vld [vmem:[#allocation7 + $0x680] ss:$16 sps:$4 sm:$0xff]  }
  0x2e   :  { %v116_v21 = vcombine.high %v108_v14, %v108_v14  ;;  %v122_v22 = vsel %vm80_vm0, %v108_v14, 0.0  ;;  %v74_v26 = vcombine.high %v66_v16, %v66_v16  ;;  %v81_v27 = vsel %vm80_vm0, %v66_v16, 0.0  ;;  %1153 = vmatprep.subr.bf16.mxu1 %v2476_v37  ;;  %v2485_v49 = vld [vmem:[#allocation7 + $0x464] ss:$16 sps:$4 sm:$0xff]   ;;  %v2487_v51 = vld [vmem:[#allocation7 + $0x460] ss:$16 sps:$4 sm:$0xff]  }
  0x2f   :  { %v117_v29 = vcombine.high %v115_v20, %v115_v20  ;;  %v125_v31 = vsel %vm80_vm0, %v115_v20, 0.0  ;;  %v75_v32 = vcombine.high %v73_v23, %v73_v23  ;;  %v84_v36 = vsel %vm80_vm0, %v73_v23, 0.0  ;;  %v2488_v52 = vld [vmem:[#allocation7 + $0x664] ss:$16 sps:$4 sm:$0xff]   ;;  %v2490_v53 = vld [vmem:[#allocation7 + $0x660] ss:$16 sps:$4 sm:$0xff]  }
  0x30   :  { %v123_v30 = vsel %vm80_vm0, %v116_v21, 0.0  ;;  %v82_v35 = vsel %vm80_vm0, %v74_v26, 0.0  ;;  %1113 = vmatpush1.bf16.msra.mxu0 %v2475_v33  ;;  %v2491_v54 = vld [vmem:[#allocation7 + $0x444] ss:$16 sps:$4 sm:$0xff]   ;;  %v2493_v55 = vld [vmem:[#allocation7 + $0x440] ss:$16 sps:$4 sm:$0xff]  }
  0x31   :  { %v124_v34 = vadd.f32 %v123_v30, %v122_v22  ;;  %v127_v39 = vsel %vm80_vm0, %v117_v29, 0.0  ;;  %v83_v40 = vadd.f32 %v82_v35, %v81_v27  ;;  %v86_v44 = vsel %vm80_vm0, %v75_v32, 0.0  ;;  %1154 = vmatpush1.bf16.msra.mxu1 %v2478_v38  ;;  %1114 = vmatprep.subr.bf16.mxu0 %v2479_v41  ;;  %v2494_v56 = vld [vmem:[#allocation7 + $0x644] ss:$16 sps:$4 sm:$0xff]   ;;  %v2496_v57 = vld [vmem:[#allocation7 + $0x640] ss:$16 sps:$4 sm:$0xff]  }
  0x32   :  { %1155 = vmatprep.subr.bf16.mxu1 %v2482_v45  ;;  %v2497_v58 = vld [vmem:[#allocation7 + $0x424] ss:$16 sps:$4 sm:$0xff]   ;;  %v2499_v59 = vld [vmem:[#allocation7 + $0x420] ss:$16 sps:$4 sm:$0xff]   ;;  %v2559_v37 = vld [vmem:[#allocation7 + $0x4ec] ss:$16 sps:$4 sm:$0xff]  }
  0x33   :  { %v126_v42 = vadd.f32 %v125_v31, %v124_v34  ;;  %v85_v43 = vadd.f32 %v84_v36, %v83_v40  ;;  %v2500_v60 = vld [vmem:[#allocation7 + $0x624] ss:$16 sps:$4 sm:$0xff]   ;;  %v2502_v61 = vld [vmem:[#allocation7 + $0x620] ss:$16 sps:$4 sm:$0xff]   ;;  %v2562_v38 = vld [vmem:[#allocation7 + $0x6ec] ss:$16 sps:$4 sm:$0xff]  }
  0x34   :  { %1115 = vmatpush1.bf16.msra.mxu0 %v2481_v47  ;;  %v2503_v62 = vld [vmem:[#allocation7 + $0x404] ss:$16 sps:$4 sm:$0xff]   ;;  %v2505_v63 = vld [vmem:[#allocation7 + $0x400] ss:$16 sps:$4 sm:$0xff]  }
  0x35   :  { %v128_v46 = vadd.f32 %v127_v39, %v126_v42  ;;  %v87_v50 = vadd.f32 %v86_v44, %v85_v43  ;;  %1156 = vmatpush1.bf16.msra.mxu1 %v2484_v48  ;;  %1116 = vmatprep.subr.bf16.mxu0 %v2485_v49  ;;  %v2506_v0 = vld [vmem:[#allocation7 + $0x604] ss:$16 sps:$4 sm:$0xff]   ;;  %v2508_v1 = vld [vmem:[#allocation7 + $0x600] ss:$16 sps:$4 sm:$0xff]  }
  0x36   :  { %1157 = vmatprep.subr.bf16.mxu1 %v2488_v52  ;;  %v2509_v2 = vld [vmem:[#allocation7 + $0x5e4] ss:$16 sps:$4 sm:$0xff]   ;;  %v2511_v4 = vld [vmem:[#allocation7 + $0x5e0] ss:$16 sps:$4 sm:$0xff]  }
  0x37   :  { %129 = vadd.xlane.f32.xlu0 %v128_v46  ;;  %v2512_v7 = vld [vmem:[#allocation7 + $0x7e4] ss:$16 sps:$4 sm:$0xff]   ;;  %v2514_v8 = vld [vmem:[#allocation7 + $0x7e0] ss:$16 sps:$4 sm:$0xff]   ;;  %v2962_v46 = vmov 269488144  }
  0x38   :  { %1117 = vmatpush1.bf16.msra.mxu0 %v2487_v51  ;;  %v2515_v9 = vld [vmem:[#allocation7 + $0x5c4] ss:$16 sps:$4 sm:$0xff]   ;;  %v2517_v10 = vld [vmem:[#allocation7 + $0x5c0] ss:$16 sps:$4 sm:$0xff]   ;;  %v142_v47 = vunpack.c.l.s4 %v2962_v46  ;;  %v2622_v46 = vld [vmem:[#allocation7 + $0x7ac] ss:$16 sps:$4 sm:$0xff]  }
  0x39   :  { %1158 = vmatpush1.bf16.msra.mxu1 %v2490_v53  ;;  %1118 = vmatprep.subr.bf16.mxu0 %v2491_v54  ;;  %v2518_v11 = vld [vmem:[#allocation7 + $0x7c4] ss:$16 sps:$4 sm:$0xff]   ;;  %v2520_v12 = vld [vmem:[#allocation7 + $0x7c0] ss:$16 sps:$4 sm:$0xff]  }
  0x3a   :  { %1159 = vmatprep.subr.bf16.mxu1 %v2494_v56  ;;  %v2521_v13 = vld [vmem:[#allocation7 + $0x5a4] ss:$16 sps:$4 sm:$0xff]   ;;  %v2523_v14 = vld [vmem:[#allocation7 + $0x5a0] ss:$16 sps:$4 sm:$0xff]   ;;  %v143_v48 = vunpack.c.0.s8 %v142_v47  ;;  %v2617_v47 = vld [vmem:[#allocation7 + $0x5a8] ss:$16 sps:$4 sm:$0xff]  }
  0x3b   :  { %88 = vadd.xlane.f32.xlu0 %v87_v50  ;;  %v2524_v15 = vld [vmem:[#allocation7 + $0x7a4] ss:$16 sps:$4 sm:$0xff]   ;;  %v2526_v16 = vld [vmem:[#allocation7 + $0x7a0] ss:$16 sps:$4 sm:$0xff]  }
  0x3c   :  { %1119 = vmatpush1.bf16.msra.mxu0 %v2493_v55  ;;  %v2527_v17 = vld [vmem:[#allocation7 + $0x584] ss:$16 sps:$4 sm:$0xff]   ;;  %v2529_v18 = vld [vmem:[#allocation7 + $0x580] ss:$16 sps:$4 sm:$0xff]   ;;  %v3020_v49 = vsub.s32 %v143_v48, %v2998_v3  ;;  %v2625_v48 = vld [vmem:[#allocation7 + $0x58c] ss:$16 sps:$4 sm:$0xff]  }
  0x3d   :  { %1160 = vmatpush1.bf16.msra.mxu1 %v2496_v57  ;;  %1120 = vmatprep.subr.bf16.mxu0 %v2497_v58  ;;  %v2530_v19 = vld [vmem:[#allocation7 + $0x784] ss:$16 sps:$4 sm:$0xff]   ;;  %v2532_v20 = vld [vmem:[#allocation7 + $0x780] ss:$16 sps:$4 sm:$0xff]  }
  0x3e   :  { %1161 = vmatprep.subr.bf16.mxu1 %v2500_v60  ;;  %v2533_v21 = vld [vmem:[#allocation7 + $0x564] ss:$16 sps:$4 sm:$0xff]   ;;  %v2535_v22 = vld [vmem:[#allocation7 + $0x560] ss:$16 sps:$4 sm:$0xff]  }
  0x3f   :  { %v2536_v23 = vld [vmem:[#allocation7 + $0x764] ss:$16 sps:$4 sm:$0xff]   ;;  %v2538_v25 = vld [vmem:[#allocation7 + $0x760] ss:$16 sps:$4 sm:$0xff]  }
  0x40   :  { %1121 = vmatpush1.bf16.msra.mxu0 %v2499_v59  ;;  %v2539_v24 = vld [vmem:[#allocation7 + $0x544] ss:$16 sps:$4 sm:$0xff]   ;;  %v2541_v27 = vld [vmem:[#allocation7 + $0x540] ss:$16 sps:$4 sm:$0xff]   ;;  %v2557_v59 = vld [vmem:[#allocation7 + $0x4e8] ss:$16 sps:$4 sm:$0xff]  }
  0x41   :  { %1162 = vmatpush1.bf16.msra.mxu1 %v2502_v61  ;;  %1122 = vmatprep.subr.bf16.mxu0 %v2503_v62  ;;  %v2542_v26 = vld [vmem:[#allocation7 + $0x744] ss:$16 sps:$4 sm:$0xff]   ;;  %v2544_v28 = vld [vmem:[#allocation7 + $0x740] ss:$16 sps:$4 sm:$0xff]   ;;  %v2560_v62 = vld [vmem:[#allocation7 + $0x6e8] ss:$16 sps:$4 sm:$0xff]  }
  0x42   :  { %1163 = vmatprep.subr.bf16.mxu1 %v2506_v0  ;;  %v2545_v29 = vld [vmem:[#allocation7 + $0x524] ss:$16 sps:$4 sm:$0xff]   ;;  %v2547_v31 = vld [vmem:[#allocation7 + $0x520] ss:$16 sps:$4 sm:$0xff]  }
  0x43   :  { %v2548_v30 = vld [vmem:[#allocation7 + $0x724] ss:$16 sps:$4 sm:$0xff]   ;;  %v2550_v33 = vld [vmem:[#allocation7 + $0x720] ss:$16 sps:$4 sm:$0xff]  }
  0x44   :  { %1123 = vmatpush1.bf16.msra.mxu0 %v2505_v63  ;;  %v2551_v32 = vld [vmem:[#allocation7 + $0x504] ss:$16 sps:$4 sm:$0xff]   ;;  %v2553_v35 = vld [vmem:[#allocation7 + $0x500] ss:$16 sps:$4 sm:$0xff]   ;;  %v2565_v63 = vld [vmem:[#allocation7 + $0x4cc] ss:$16 sps:$4 sm:$0xff]  }
  0x45   :  { %1164 = vmatpush1.bf16.msra.mxu1 %v2508_v1  ;;  %1124 = vmatprep.subr.bf16.mxu0 %v2509_v2  ;;  %v2554_v34 = vld [vmem:[#allocation7 + $0x704] ss:$16 sps:$4 sm:$0xff]   ;;  %v2556_v36 = vld [vmem:[#allocation7 + $0x700] ss:$16 sps:$4 sm:$0xff]   ;;  %v2568_v1 = vld [vmem:[#allocation7 + $0x6cc] ss:$16 sps:$4 sm:$0xff]  }
  0x46   :  { %1165 = vmatprep.subr.bf16.mxu1 %v2512_v7  ;;  %v2563_v2 = vld [vmem:[#allocation7 + $0x4c8] ss:$16 sps:$4 sm:$0xff]  }
  0x47   :  { %v2566_v7 = vld [vmem:[#allocation7 + $0x6c8] ss:$16 sps:$4 sm:$0xff]  }
  0x48   :  { %1125 = vmatpush2.bf16.msra.mxu0 %v2511_v4  ;;  %v2571_v4 = vld [vmem:[#allocation7 + $0x4ac] ss:$16 sps:$4 sm:$0xff]  }
  0x49   :  { %1166 = vmatpush2.bf16.msra.mxu1 %v2514_v8  ;;  %1126 = vmatprep.subr.bf16.mxu0 %v2515_v9  ;;  %v2574_v8 = vld [vmem:[#allocation7 + $0x6ac] ss:$16 sps:$4 sm:$0xff]   ;;  %v2569_v9 = vld [vmem:[#allocation7 + $0x4a8] ss:$16 sps:$4 sm:$0xff]  }
  0x4a   :  { %1167 = vmatprep.subr.bf16.mxu1 %v2518_v11  ;;  %v2572_v11 = vld [vmem:[#allocation7 + $0x6a8] ss:$16 sps:$4 sm:$0xff]  }
  0x4c   :  { %1127 = vmatpush2.bf16.msra.mxu0 %v2517_v10  ;;  %v2577_v10 = vld [vmem:[#allocation7 + $0x48c] ss:$16 sps:$4 sm:$0xff]  }
  0x4d   :  { %1168 = vmatpush2.bf16.msra.mxu1 %v2520_v12  ;;  %1128 = vmatprep.subr.bf16.mxu0 %v2521_v13  ;;  %v2580_v12 = vld [vmem:[#allocation7 + $0x68c] ss:$16 sps:$4 sm:$0xff]   ;;  %v2575_v13 = vld [vmem:[#allocation7 + $0x488] ss:$16 sps:$4 sm:$0xff]  }
  0x4e   :  { %1169 = vmatprep.subr.bf16.mxu1 %v2524_v15  ;;  %v2578_v15 = vld [vmem:[#allocation7 + $0x688] ss:$16 sps:$4 sm:$0xff]  }
  0x50   :  { %1129 = vmatpush2.bf16.msra.mxu0 %v2523_v14  ;;  %v2583_v14 = vld [vmem:[#allocation7 + $0x46c] ss:$16 sps:$4 sm:$0xff]  }
  0x51   :  { %1170 = vmatpush2.bf16.msra.mxu1 %v2526_v16  ;;  %1130 = vmatprep.subr.bf16.mxu0 %v2527_v17  ;;  %v2586_v17 = vld [vmem:[#allocation7 + $0x66c] ss:$16 sps:$4 sm:$0xff]  }
  0x52   :  { %1171 = vmatprep.subr.bf16.mxu1 %v2530_v19  ;;  %v2589_v19 = vld [vmem:[#allocation7 + $0x44c] ss:$16 sps:$4 sm:$0xff]  }
  0x54   :  { %1131 = vmatpush2.bf16.msra.mxu0 %v2529_v18  ;;  %v2581_v18 = vld [vmem:[#allocation7 + $0x468] ss:$16 sps:$4 sm:$0xff]  }
  0x55   :  { %1132 = vmatprep.subr.bf16.mxu0 %v2533_v21  ;;  %1172 = vmatpush2.bf16.msra.mxu1 %v2532_v20  ;;  %v2584_v21 = vld [vmem:[#allocation7 + $0x668] ss:$16 sps:$4 sm:$0xff]  }
  0x56   :  { %1173 = vmatprep.subr.bf16.mxu1 %v2536_v23  ;;  %v2587_v23 = vld [vmem:[#allocation7 + $0x448] ss:$16 sps:$4 sm:$0xff]  }
  0x58   :  { %1133 = vmatpush2.bf16.msra.mxu0 %v2535_v22  ;;  %v2592_v22 = vld [vmem:[#allocation7 + $0x64c] ss:$16 sps:$4 sm:$0xff]  }
  0x59   :  { %1134 = vmatprep.subr.bf16.mxu0 %v2539_v24  ;;  %1174 = vmatpush2.bf16.msra.mxu1 %v2538_v25  ;;  %v2595_v25 = vld [vmem:[#allocation7 + $0x42c] ss:$16 sps:$4 sm:$0xff]  }
  0x5a   :  { %1175 = vmatprep.subr.bf16.mxu1 %v2542_v26 }
  0x5c   :  { %1135 = vmatpush2.bf16.msra.mxu0 %v2541_v27  ;;  %v2590_v27 = vld [vmem:[#allocation7 + $0x648] ss:$16 sps:$4 sm:$0xff]  }
  0x5d   :  { %1136 = vmatprep.subr.bf16.mxu0 %v2545_v29  ;;  %1176 = vmatpush2.bf16.msra.mxu1 %v2544_v28  ;;  %v2598_v28 = vld [vmem:[#allocation7 + $0x62c] ss:$16 sps:$4 sm:$0xff]   ;;  %v2593_v29 = vld [vmem:[#allocation7 + $0x428] ss:$16 sps:$4 sm:$0xff]  }
  0x5e   :  { %1177 = vmatprep.subr.bf16.mxu1 %v2548_v30 }
  0x60   :  { %1137 = vmatpush2.bf16.msra.mxu0 %v2547_v31  ;;  %v2601_v31 = vld [vmem:[#allocation7 + $0x40c] ss:$16 sps:$4 sm:$0xff]  }
  0x61   :  { %1138 = vmatprep.subr.bf16.mxu0 %v2551_v32  ;;  %1178 = vmatpush2.bf16.msra.mxu1 %v2550_v33  ;;  %v2596_v32 = vld [vmem:[#allocation7 + $0x628] ss:$16 sps:$4 sm:$0xff]   ;;  %v2604_v33 = vld [vmem:[#allocation7 + $0x60c] ss:$16 sps:$4 sm:$0xff]  }
  0x62   :  { %1179 = vmatprep.subr.bf16.mxu1 %v2554_v34 }
  0x64   :  { %1139 = vmatpush2.bf16.msra.mxu0 %v2553_v35  ;;  %v2599_v35 = vld [vmem:[#allocation7 + $0x408] ss:$16 sps:$4 sm:$0xff]  }
  0x65   :  { %1180 = vmatpush2.bf16.msra.mxu1 %v2556_v36  ;;  %1190 = vmatprep.subr.bf16.mxu0 %v2559_v37  ;;  %v2607_v36 = vld [vmem:[#allocation7 + $0x5ec] ss:$16 sps:$4 sm:$0xff]   ;;  %v2602_v37 = vld [vmem:[#allocation7 + $0x608] ss:$16 sps:$4 sm:$0xff]  }
  0x66   :  { %1231 = vmatprep.subr.bf16.mxu1 %v2562_v38  ;;  %v2610_v38 = vld [vmem:[#allocation7 + $0x7ec] ss:$16 sps:$4 sm:$0xff]  }
  0xc0   :  { %v130_v39 = vpop.xlane.xlu0 %129 }
  0xc1   :  { %2845 = vrsqrt.f32 %v130_v39  ;;  %vm133_vm1 = vcmp.eq.f32.partialorder %v130_v39, inf  ;;  %v136_v42 = vand.u32 2147483648, %v130_v39  ;;  %vm135_vm2 = vcmp.eq.f32.partialorder %v130_v39, 0.0 }
  0xc4   :  { %v3031_v57 = vpop.xlane.xlu0 %88 }
  0xc5   :  { %vm92_vm3 = vcmp.eq.f32.partialorder %v3031_v57, inf  ;;  %v95_v24 = vand.u32 2147483648, %v3031_v57  ;;  %vm94_vm4 = vcmp.eq.f32.partialorder %v3031_v57, 0.0 }
  0xce   :  { %v2846_v40 = vpop.eup %2845 }
  0xcf   :  { %v132_v41 = vmul.f32 %v2846_v40, %v130_v39  ;;  %v2613_v40 = vld [vmem:[#allocation7 + $0x5cc] ss:$16 sps:$4 sm:$0xff]  }
  0xd1   :  { %v134_v43 = vsel %vm133_vm1, %v130_v39, %v132_v41  ;;  %v2605_v39 = vld [vmem:[#allocation7 + $0x5e8] ss:$16 sps:$4 sm:$0xff]  }
  0xd2   :  { %v137_v44 = vsel %vm135_vm2, %v136_v42, %v134_v43  ;;  %v2608_v41 = vld [vmem:[#allocation7 + $0x7e8] ss:$16 sps:$4 sm:$0xff]   ;;  %v2616_v42 = vld [vmem:[#allocation7 + $0x7cc] ss:$16 sps:$4 sm:$0xff]  }
  0xd3   :  { %v138_v45 = vadd.f32 1e-08, %v137_v44  ;;  %v2611_v43 = vld [vmem:[#allocation7 + $0x5c8] ss:$16 sps:$4 sm:$0xff]   ;;  %v2619_v44 = vld [vmem:[#allocation7 + $0x5ac] ss:$16 sps:$4 sm:$0xff]  }
  0xd5   :  { %2847 = vrcp.f32 %v138_v45  ;;  %v2614_v45 = vld [vmem:[#allocation7 + $0x7c8] ss:$16 sps:$4 sm:$0xff]  }
  0xd6   :  { %2849 = vrsqrt.f32 %v3031_v57 }
  0xe2   :  { %v2848_v50 = vpop.eup %2847 }
  0xe3   :  { %v157_v51 = vrot.slane %v2848_v50, %v3020_v49  ;;  %v2850_v16 = vpop.eup %2849  ;;  %v2620_v50 = vld [vmem:[#allocation7 + $0x7a8] ss:$16 sps:$4 sm:$0xff]  }
  0xe4   :  { %v91_v20 = vmul.f32 %v2850_v16, %v3031_v57 }
  0xe5   :  { %v3024_v52 = vmul.f32 %v157_v51, %v3003_v6  ;;  %v2628_v51 = vld [vmem:[#allocation7 + $0x78c] ss:$16 sps:$4 sm:$0xff]  }
  0xe6   :  { %v93_v26 = vsel %vm92_vm3, %v3031_v57, %v91_v20  ;;  %v2634_v57 = vld [vmem:[#allocation7 + $0x76c] ss:$16 sps:$4 sm:$0xff]   ;;  %v2658_v20 = vld [vmem:[#allocation7 + $0x2e4] ss:$16 sps:$4 sm:$0xff]  }
  0xe7   :  { %v450_v53 = vrot.slane %v3024_v52, %v3001_v5  ;;  %v443_v54 = vcombine.high %v3024_v52, %v3024_v52  ;;  %v96_v30 = vsel %vm94_vm4, %v95_v24, %v93_v26  ;;  %v2656_v24 = vld [vmem:[#allocation7 + $0x2e0] ss:$16 sps:$4 sm:$0xff]   ;;  %v2664_v26 = vld [vmem:[#allocation7 + $0x2c4] ss:$16 sps:$4 sm:$0xff]  }
  0xe8   :  { %v97_v34 = vadd.f32 1e-08, %v96_v30  ;;  %v2670_v30 = vld [vmem:[#allocation7 + $0x2a4] ss:$16 sps:$4 sm:$0xff]  }
  0xe9   :  { %v458_v55 = vcombine.high %v450_v53, %v450_v53  ;;  %v457_v56 = vrot.slane %v443_v54, %v3001_v5  ;;  %v3033_v61 = vpack.c.bf16 %v450_v53, %v450_v53  ;;  %v2623_v53 = vld [vmem:[#allocation7 + $0x588] ss:$16 sps:$4 sm:$0xff]  }
  0xea   :  { %2851 = vrcp.f32 %v97_v34  ;;  %v2671_v34 = vld [vmem:[#allocation7 + $0x80] ss:$16 sps:$4 sm:$0xff]  }
  0xeb   :  { %v465_v58 = vpack.c.bf16 %v458_v55, %v458_v55  ;;  %v459_v60 = vcombine.high %v457_v56, %v457_v56  ;;  %v3037_v0 = vpack.c.bf16 %v457_v56, %v457_v56  ;;  %v2631_v55 = vld [vmem:[#allocation7 + $0x56c] ss:$16 sps:$4 sm:$0xff]   ;;  %v2626_v56 = vld [vmem:[#allocation7 + $0x788] ss:$16 sps:$4 sm:$0xff]  }
  0xed   :  { %1140 = vmatprep.mubr.bf16.mxu0 %v465_v58  ;;  %v467_v6 = vpack.c.bf16 %v459_v60, %v459_v60  ;;  %v2637_v60 = vld [vmem:[#allocation7 + $0x54c] ss:$16 sps:$4 sm:$0xff]  }
  0xee   :  { %1141 = vmatmul.mubr.bf16.vlgmr.msra.gmra.mxu0 %v3033_v61 }
  0xef   :  { %1191 = vmatpush1.bf16.msra.mxu0 %v2557_v59  ;;  %1181 = vmatprep.mubr.bf16.mxu1 %v467_v6 }
  0xf0   :  { %1222 = vmatprep.mubr.bf16.mxu0 %v465_v58  ;;  %1182 = vmatmul.mubr.bf16.vlgmr.msra.gmra.mxu1 %v3037_v0  ;;  %v2629_v58 = vld [vmem:[#allocation7 + $0x568] ss:$16 sps:$4 sm:$0xff]  }
  0xf1   :  { %1232 = vmatpush1.bf16.msra.mxu1 %v2560_v62  ;;  %1192 = vmatprep.subr.bf16.mxu0 %v2565_v63  ;;  %v2640_v62 = vld [vmem:[#allocation7 + $0x74c] ss:$16 sps:$4 sm:$0xff]   ;;  %v2635_v63 = vld [vmem:[#allocation7 + $0x548] ss:$16 sps:$4 sm:$0xff]  }
  0xf2   :  { %1263 = vmatprep.mubr.bf16.mxu1 %v467_v6  ;;  %1233 = vmatprep.subr.bf16.mxu1 %v2568_v1  ;;  %v2632_v6 = vld [vmem:[#allocation7 + $0x768] ss:$16 sps:$4 sm:$0xff]   ;;  %v2869_v1 = vld [vmem:[#allocation2] sm:$0xff] }
  0xf3   :  { %1193 = vmatpush1.bf16.msra.mxu0 %v2563_v2 }
  0xf4   :  { %1194 = vmatprep.subr.bf16.mxu0 %v2571_v4  ;;  %v2643_v4 = vld [vmem:[#allocation7 + $0x52c] ss:$16 sps:$4 sm:$0xff]  }
  0xf5   :  { %1234 = vmatpush1.bf16.msra.mxu1 %v2566_v7  ;;  %v2638_v7 = vld [vmem:[#allocation7 + $0x748] ss:$16 sps:$4 sm:$0xff]  }
  0xf6   :  { %1235 = vmatprep.subr.bf16.mxu1 %v2574_v8 }
  0xf7   :  { %1195 = vmatpush1.bf16.msra.mxu0 %v2569_v9  ;;  %v2852_v54 = vpop.eup %2851  ;;  %v2641_v9 = vld [vmem:[#allocation7 + $0x528] ss:$16 sps:$4 sm:$0xff]  }
  0xf8   :  { %1196 = vmatprep.subr.bf16.mxu0 %v2577_v10  ;;  %v147_v59 = vrot.slane %v2852_v54, %v3020_v49  ;;  %v2646_v49 = vld [vmem:[#allocation7 + $0x72c] ss:$16 sps:$4 sm:$0xff]   ;;  %v2706_v54 = vld [vmem:[#allocation7 + $0x3e4] ss:$16 sps:$4 sm:$0xff]  }
  0xf9   :  { %1236 = vmatpush1.bf16.msra.mxu1 %v2572_v11  ;;  %v2649_v11 = vld [vmem:[#allocation7 + $0x50c] ss:$16 sps:$4 sm:$0xff]  }
  0xfa   :  { %1237 = vmatprep.subr.bf16.mxu1 %v2580_v12  ;;  %v3046_v2 = vmul.f32 %v2869_v1, %v147_v59  ;;  %v2644_v12 = vld [vmem:[#allocation7 + $0x728] ss:$16 sps:$4 sm:$0xff]   ;;  %v2707_v59 = vld [vmem:[#allocation7 + $0x1c0] ss:$16 sps:$4 sm:$0xff]   ;;  %v2721_v1 = vld [vmem:[#allocation7 + $0x184] ss:$16 sps:$4 sm:$0xff]  }
  0xfb   :  { %1197 = vmatpush1.bf16.msra.mxu0 %v2575_v13 }
  0xfc   :  { %1198 = vmatprep.subr.bf16.mxu0 %v2583_v14  ;;  %v417_v8 = vcombine.high %v3046_v2, %v3046_v2  ;;  %v3052_v10 = vrot.slane %v3046_v2, %v3001_v5  ;;  %v2652_v14 = vld [vmem:[#allocation7 + $0x70c] ss:$16 sps:$4 sm:$0xff]  }
  0xfd   :  { %1238 = vmatpush1.bf16.msra.mxu1 %v2578_v15  ;;  %v2647_v15 = vld [vmem:[#allocation7 + $0x508] ss:$16 sps:$4 sm:$0xff]  }
  0xfe   :  { %1239 = vmatprep.subr.bf16.mxu1 %v2586_v17  ;;  %v3055_v13 = vrot.slane %v417_v8, %v3001_v5  ;;  %v432_v16 = vcombine.high %v3052_v10, %v3052_v10  ;;  %v2655_v17 = vld [vmem:[#allocation7 + $0xe4] ss:$16 sps:$4 sm:$0xff]   ;;  %v2719_v8 = vld [vmem:[#allocation7 + $0x180] ss:$16 sps:$4 sm:$0xff]  }
  0xff   :  { %1199 = vmatpush1.bf16.msra.mxu0 %v2581_v18  ;;  %v2650_v18 = vld [vmem:[#allocation7 + $0x708] ss:$16 sps:$4 sm:$0xff]  }
 0x100   :  { %1200 = vmatprep.subr.bf16.mxu0 %v2589_v19  ;;  %v433_v19 = vcombine.high %v3055_v13, %v3055_v13 }
 0x101   :  { %1240 = vmatpush1.bf16.msra.mxu1 %v2584_v21  ;;  %v2653_v21 = vld [vmem:[#allocation7 + $0xe0] ss:$16 sps:$4 sm:$0xff]  }
 0x102   :  { %1241 = vmatprep.subr.bf16.mxu1 %v2592_v22  ;;  %v3061_v22 = vpack.c.bf16 %v432_v16, %v432_v16  ;;  %v2736_v16 = vld [vmem:[#allocation7 + $0x344] ss:$16 sps:$4 sm:$0xff]  }
 0x103   :  { %1201 = vmatpush1.bf16.msra.mxu0 %v2587_v23  ;;  %v2661_v23 = vld [vmem:[#allocation7 + $0xc4] ss:$16 sps:$4 sm:$0xff]  }
 0x104   :  { %1202 = vmatprep.subr.bf16.mxu0 %v2595_v25  ;;  %v3063_v25 = vpack.c.bf16 %v433_v19, %v433_v19  ;;  %v2734_v19 = vld [vmem:[#allocation7 + $0x340] ss:$16 sps:$4 sm:$0xff]  }
 0x105   :  { %1242 = vmatpush1.bf16.msra.mxu1 %v2590_v27  ;;  %v2659_v27 = vld [vmem:[#allocation7 + $0xc0] ss:$16 sps:$4 sm:$0xff]  }
 0x106   :  { %1243 = vmatprep.subr.bf16.mxu1 %v2598_v28  ;;  %v2667_v28 = vld [vmem:[#allocation7 + $0xa4] ss:$16 sps:$4 sm:$0xff]  }
 0x107   :  { %1203 = vmatpush1.bf16.msra.mxu0 %v2593_v29  ;;  %v2662_v29 = vld [vmem:[#allocation7 + $0x2c0] ss:$16 sps:$4 sm:$0xff]  }
 0x108   :  { %1204 = vmatprep.subr.bf16.mxu0 %v2601_v31  ;;  %v2665_v31 = vld [vmem:[#allocation7 + $0xa0] ss:$16 sps:$4 sm:$0xff]  }
 0x109   :  { %1244 = vmatpush1.bf16.msra.mxu1 %v2596_v32  ;;  %v2668_v32 = vld [vmem:[#allocation7 + $0x2a0] ss:$16 sps:$4 sm:$0xff]  }
 0x10a   :  { %1245 = vmatprep.subr.bf16.mxu1 %v2604_v33  ;;  %v2676_v33 = vld [vmem:[#allocation7 + $0x284] ss:$16 sps:$4 sm:$0xff]  }
 0x10b   :  { %1205 = vmatpush1.bf16.msra.mxu0 %v2599_v35  ;;  %v2674_v35 = vld [vmem:[#allocation7 + $0x280] ss:$16 sps:$4 sm:$0xff]  }
 0x10c   :  { %1206 = vmatprep.subr.bf16.mxu0 %v2607_v36  ;;  %v2682_v36 = vld [vmem:[#allocation7 + $0x264] ss:$16 sps:$4 sm:$0xff]  }
 0x10d   :  { %1246 = vmatpush1.bf16.msra.mxu1 %v2602_v37  ;;  %v2677_v37 = vld [vmem:[#allocation7 + $0x60] ss:$16 sps:$4 sm:$0xff]  }
 0x10e   :  { %1247 = vmatprep.subr.bf16.mxu1 %v2610_v38  ;;  %v2685_v38 = vld [vmem:[#allocation7 + $0x44] ss:$16 sps:$4 sm:$0xff]  }
 0x10f   :  { %1207 = vmatpush2.bf16.msra.mxu0 %v2605_v39  ;;  %v2680_v39 = vld [vmem:[#allocation7 + $0x260] ss:$16 sps:$4 sm:$0xff]  }
 0x110   :  { %1208 = vmatprep.subr.bf16.mxu0 %v2613_v40  ;;  %v2688_v40 = vld [vmem:[#allocation7 + $0x244] ss:$16 sps:$4 sm:$0xff]  }
 0x111   :  { %1248 = vmatpush2.bf16.msra.mxu1 %v2608_v41  ;;  %v2683_v41 = vld [vmem:[#allocation7 + $0x40] ss:$16 sps:$4 sm:$0xff]  }
 0x112   :  { %1249 = vmatprep.subr.bf16.mxu1 %v2616_v42  ;;  %v2691_v42 = vld [vmem:[#allocation7 + $0x24] ss:$16 sps:$4 sm:$0xff]  }
 0x113   :  { %1209 = vmatpush2.bf16.msra.mxu0 %v2611_v43  ;;  %v2686_v43 = vld [vmem:[#allocation7 + $0x240] ss:$16 sps:$4 sm:$0xff]  }
 0x114   :  { %1210 = vmatprep.subr.bf16.mxu0 %v2619_v44  ;;  %v2694_v44 = vld [vmem:[#allocation7 + $0x224] ss:$16 sps:$4 sm:$0xff]  }
 0x115   :  { %1250 = vmatpush2.bf16.msra.mxu1 %v2614_v45  ;;  %v2689_v45 = vld [vmem:[#allocation7 + $0x20] ss:$16 sps:$4 sm:$0xff]  }
 0x116   :  { %1251 = vmatprep.subr.bf16.mxu1 %v2622_v46  ;;  %v2697_v46 = vld [vmem:[#allocation7 + $0x4] ss:$16 sps:$4 sm:$0xff]  }
 0x117   :  { %1211 = vmatpush2.bf16.msra.mxu0 %v2617_v47  ;;  %v2692_v47 = vld [vmem:[#allocation7 + $0x220] ss:$16 sps:$4 sm:$0xff]  }
 0x118   :  { %1212 = vmatprep.subr.bf16.mxu0 %v2625_v48  ;;  %v2700_v48 = vld [vmem:[#allocation7 + $0x204] ss:$16 sps:$4 sm:$0xff]  }
 0x119   :  { %1252 = vmatpush2.bf16.msra.mxu1 %v2620_v50  ;;  %v2695_v50 = vld [vmem:[#allocation7] ss:$16 sps:$4 sm:$0xff]  }
 0x11a   :  { %1253 = vmatprep.subr.bf16.mxu1 %v2628_v51  ;;  %v2703_v51 = vld [vmem:[#allocation7 + $0x1e4] ss:$16 sps:$4 sm:$0xff]  }
 0x11b   :  { %1213 = vmatpush2.bf16.msra.mxu0 %v2623_v53  ;;  %v2698_v53 = vld [vmem:[#allocation7 + $0x200] ss:$16 sps:$4 sm:$0xff]  }
 0x11c   :  { %1214 = vmatprep.subr.bf16.mxu0 %v2631_v55  ;;  %v2701_v55 = vld [vmem:[#allocation7 + $0x1e0] ss:$16 sps:$4 sm:$0xff]  }
 0x11d   :  { %1254 = vmatpush2.bf16.msra.mxu1 %v2626_v56  ;;  %v2709_v56 = vld [vmem:[#allocation7 + $0x1c4] ss:$16 sps:$4 sm:$0xff]  }
 0x11e   :  { %1255 = vmatprep.subr.bf16.mxu1 %v2634_v57  ;;  %v2704_v57 = vld [vmem:[#allocation7 + $0x3e0] ss:$16 sps:$4 sm:$0xff]  }
 0x11f   :  { %1215 = vmatpush2.bf16.msra.mxu0 %v2629_v58  ;;  %v2712_v58 = vld [vmem:[#allocation7 + $0x3c4] ss:$16 sps:$4 sm:$0xff]  }
 0x120   :  { %1216 = vmatprep.subr.bf16.mxu0 %v2637_v60  ;;  %v2715_v60 = vld [vmem:[#allocation7 + $0x1a4] ss:$16 sps:$4 sm:$0xff]  }
 0x121   :  { %1256 = vmatpush2.bf16.msra.mxu1 %v2632_v6  ;;  %v2710_v6 = vld [vmem:[#allocation7 + $0x3c0] ss:$16 sps:$4 sm:$0xff]  }
 0x122   :  { %1257 = vmatprep.subr.bf16.mxu1 %v2640_v62  ;;  %v2718_v62 = vld [vmem:[#allocation7 + $0x3a4] ss:$16 sps:$4 sm:$0xff]  }
 0x123   :  { %1217 = vmatpush2.bf16.msra.mxu0 %v2635_v63  ;;  %v2713_v63 = vld [vmem:[#allocation7 + $0x1a0] ss:$16 sps:$4 sm:$0xff]  }
 0x124   :  { %1218 = vmatprep.subr.bf16.mxu0 %v2643_v4  ;;  %v2716_v4 = vld [vmem:[#allocation7 + $0x3a0] ss:$16 sps:$4 sm:$0xff]  }
 0x125   :  { %1258 = vmatpush2.bf16.msra.mxu1 %v2638_v7  ;;  %v2724_v7 = vld [vmem:[#allocation7 + $0x384] ss:$16 sps:$4 sm:$0xff]  }
 0x126   :  { %1259 = vmatprep.subr.bf16.mxu1 %v2646_v49  ;;  %v2727_v49 = vld [vmem:[#allocation7 + $0x164] ss:$16 sps:$4 sm:$0xff]  }
 0x127   :  { %1219 = vmatpush2.bf16.msra.mxu0 %v2641_v9  ;;  %v2722_v9 = vld [vmem:[#allocation7 + $0x380] ss:$16 sps:$4 sm:$0xff]  }
 0x128   :  { %1220 = vmatprep.subr.bf16.mxu0 %v2649_v11  ;;  %v2730_v11 = vld [vmem:[#allocation7 + $0x364] ss:$16 sps:$4 sm:$0xff]  }
 0x129   :  { %1260 = vmatpush2.bf16.msra.mxu1 %v2644_v12  ;;  %v2725_v12 = vld [vmem:[#allocation7 + $0x160] ss:$16 sps:$4 sm:$0xff]  }
 0x12a   :  { %1261 = vmatprep.subr.bf16.mxu1 %v2652_v14  ;;  %v2733_v14 = vld [vmem:[#allocation7 + $0x144] ss:$16 sps:$4 sm:$0xff]  }
 0x12b   :  { %1221 = vmatpush2.bf16.msra.mxu0 %v2647_v15  ;;  %v2728_v15 = vld [vmem:[#allocation7 + $0x360] ss:$16 sps:$4 sm:$0xff]  }
 0x12c   :  { %1912 = vmatprep.subr.bf16.mxu0 %v2655_v17  ;;  %v2731_v17 = vld [vmem:[#allocation7 + $0x140] ss:$16 sps:$4 sm:$0xff]  }
 0x12d   :  { %1262 = vmatpush2.bf16.msra.mxu1 %v2650_v18  ;;  %v2739_v18 = vld [vmem:[#allocation7 + $0x124] ss:$16 sps:$4 sm:$0xff]  }
 0x12e   :  { %1223 = vmatmul.mubr.bf16.vlgmr.msra.gmra.mxu0 %v3033_v61  ;;  %1953 = vmatprep.subr.bf16.mxu1 %v2658_v20  ;;  %v2673_v61 = vld [vmem:[#allocation7 + $0x84] ss:$16 sps:$4 sm:$0xff]  }
 0x12f   :  { %1913 = vmatpush1.bf16.msra.mxu0 %v2653_v21  ;;  %1944 = vmatprep.mubr.bf16.mxu0 %v3061_v22  ;;  %v2742_v20 = vld [vmem:[#allocation7 + $0x324] ss:$16 sps:$4 sm:$0xff]   ;;  %v2737_v21 = vld [vmem:[#allocation7 + $0x120] ss:$16 sps:$4 sm:$0xff]  }
 0x130   :  { %1264 = vmatmul.mubr.bf16.vlgmr.msra.gmra.mxu1 %v3037_v0  ;;  %1914 = vmatprep.subr.bf16.mxu0 %v2661_v23  ;;  %v2679_v0 = vld [vmem:[#allocation7 + $0x64] ss:$16 sps:$4 sm:$0xff]  }
 0x131   :  { %1954 = vmatpush1.bf16.msra.mxu1 %v2656_v24  ;;  %1985 = vmatprep.mubr.bf16.mxu1 %v3063_v25  ;;  %v2745_v23 = vld [vmem:[#allocation7 + $0x104] ss:$16 sps:$4 sm:$0xff]   ;;  %v2740_v24 = vld [vmem:[#allocation7 + $0x320] ss:$16 sps:$4 sm:$0xff]  }
 0x132   :  { %1955 = vmatprep.subr.bf16.mxu1 %v2664_v26  ;;  %v2748_v26 = vld [vmem:[#allocation7 + $0x304] ss:$16 sps:$4 sm:$0xff]  }
 0x133   :  { %1915 = vmatpush1.bf16.msra.mxu0 %v2659_v27  ;;  %v2743_v27 = vld [vmem:[#allocation7 + $0x100] ss:$16 sps:$4 sm:$0xff]  }
 0x134   :  { %1916 = vmatprep.subr.bf16.mxu0 %v2667_v28  ;;  %v2751_v28 = vld [vmem:[#allocation7 + $0xec] ss:$16 sps:$4 sm:$0xff]  }
 0x135   :  { %1956 = vmatpush1.bf16.msra.mxu1 %v2662_v29  ;;  %v2746_v29 = vld [vmem:[#allocation7 + $0x300] ss:$16 sps:$4 sm:$0xff]  }
 0x136   :  { %1957 = vmatprep.subr.bf16.mxu1 %v2670_v30  ;;  %v2754_v30 = vld [vmem:[#allocation7 + $0x2ec] ss:$16 sps:$4 sm:$0xff]  }
 0x137   :  { %1917 = vmatpush1.bf16.msra.mxu0 %v2665_v31  ;;  %v2749_v31 = vld [vmem:[#allocation7 + $0xe8] ss:$16 sps:$4 sm:$0xff]  }
 0x138   :  { %1918 = vmatprep.subr.bf16.mxu0 %v2673_v61  ;;  %v3071_v61 = vpack.c.bf16 %v3052_v10, %v3052_v10  ;;  %v2763_v10 = vld [vmem:[#allocation7 + $0xac] ss:$16 sps:$4 sm:$0xff]  }
 0x139   :  { %1958 = vmatpush1.bf16.msra.mxu1 %v2668_v32  ;;  %v2757_v32 = vld [vmem:[#allocation7 + $0xcc] ss:$16 sps:$4 sm:$0xff]  }
 0x13a   :  { %1959 = vmatprep.subr.bf16.mxu1 %v2676_v33  ;;  %v2752_v33 = vld [vmem:[#allocation7 + $0x2e8] ss:$16 sps:$4 sm:$0xff]  }
 0x13b   :  { %1919 = vmatpush1.bf16.msra.mxu0 %v2671_v34  ;;  %v3076_v34 = vpack.c.bf16 %v3055_v13, %v3055_v13  ;;  %v2769_v13 = vld [vmem:[#allocation7 + $0x8c] ss:$16 sps:$4 sm:$0xff]  }
 0x13c   :  { %1920 = vmatprep.subr.bf16.mxu0 %v2679_v0  ;;  %v2760_v0 = vld [vmem:[#allocation7 + $0x2cc] ss:$16 sps:$4 sm:$0xff]  }
 0x13d   :  { %1960 = vmatpush1.bf16.msra.mxu1 %v2674_v35  ;;  %v2755_v35 = vld [vmem:[#allocation7 + $0xc8] ss:$16 sps:$4 sm:$0xff]  }
 0x13e   :  { %1961 = vmatprep.subr.bf16.mxu1 %v2682_v36  ;;  %v2758_v36 = vld [vmem:[#allocation7 + $0x2c8] ss:$16 sps:$4 sm:$0xff]  }
 0x13f   :  { %1921 = vmatpush1.bf16.msra.mxu0 %v2677_v37  ;;  %v2766_v37 = vld [vmem:[#allocation7 + $0x2ac] ss:$16 sps:$4 sm:$0xff]  }
 0x140   :  { %1922 = vmatprep.subr.bf16.mxu0 %v2685_v38  ;;  %v2761_v38 = vld [vmem:[#allocation7 + $0xa8] ss:$16 sps:$4 sm:$0xff]  }
 0x141   :  { %1962 = vmatpush1.bf16.msra.mxu1 %v2680_v39  ;;  %v2764_v39 = vld [vmem:[#allocation7 + $0x2a8] ss:$16 sps:$4 sm:$0xff]  }
 0x142   :  { %1963 = vmatprep.subr.bf16.mxu1 %v2688_v40  ;;  %v2772_v40 = vld [vmem:[#allocation7 + $0x28c] ss:$16 sps:$4 sm:$0xff]  }
 0x143   :  { %1923 = vmatpush1.bf16.msra.mxu0 %v2683_v41  ;;  %v2775_v41 = vld [vmem:[#allocation7 + $0x6c] ss:$16 sps:$4 sm:$0xff]  }
 0x144   :  { %1924 = vmatprep.subr.bf16.mxu0 %v2691_v42  ;;  %v2770_v42 = vld [vmem:[#allocation7 + $0x288] ss:$16 sps:$4 sm:$0xff]  }
 0x145   :  { %1964 = vmatpush1.bf16.msra.mxu1 %v2686_v43  ;;  %v2778_v43 = vld [vmem:[#allocation7 + $0x26c] ss:$16 sps:$4 sm:$0xff]  }
 0x146   :  { %1965 = vmatprep.subr.bf16.mxu1 %v2694_v44  ;;  %v2781_v44 = vld [vmem:[#allocation7 + $0x4c] ss:$16 sps:$4 sm:$0xff]  }
 0x147   :  { %1925 = vmatpush1.bf16.msra.mxu0 %v2689_v45  ;;  %v2776_v45 = vld [vmem:[#allocation7 + $0x268] ss:$16 sps:$4 sm:$0xff]  }
 0x148   :  { %1926 = vmatprep.subr.bf16.mxu0 %v2697_v46  ;;  %v2784_v46 = vld [vmem:[#allocation7 + $0x24c] ss:$16 sps:$4 sm:$0xff]  }
 0x149   :  { %1966 = vmatpush1.bf16.msra.mxu1 %v2692_v47  ;;  %v2779_v47 = vld [vmem:[#allocation7 + $0x48] ss:$16 sps:$4 sm:$0xff]  }
 0x14a   :  { %1967 = vmatprep.subr.bf16.mxu1 %v2700_v48  ;;  %v2787_v48 = vld [vmem:[#allocation7 + $0x2c] ss:$16 sps:$4 sm:$0xff]  }
 0x14b   :  { %1927 = vmatpush1.bf16.msra.mxu0 %v2695_v50  ;;  %v2782_v50 = vld [vmem:[#allocation7 + $0x248] ss:$16 sps:$4 sm:$0xff]  }
 0x14c   :  { %1928 = vmatprep.subr.bf16.mxu0 %v2703_v51  ;;  %v2790_v51 = vld [vmem:[#allocation7 + $0x22c] ss:$16 sps:$4 sm:$0xff]  }
 0x14d   :  { %1968 = vmatpush1.bf16.msra.mxu1 %v2698_v53  ;;  %v2785_v53 = vld [vmem:[#allocation7 + $0x28] ss:$16 sps:$4 sm:$0xff]  }
 0x14e   :  { %1969 = vmatprep.subr.bf16.mxu1 %v2706_v54  ;;  %v2793_v54 = vld [vmem:[#allocation7 + $0xc] ss:$16 sps:$4 sm:$0xff]  }
 0x14f   :  { %1929 = vmatpush2.bf16.msra.mxu0 %v2701_v55  ;;  %v2788_v55 = vld [vmem:[#allocation7 + $0x228] ss:$16 sps:$4 sm:$0xff]  }
 0x150   :  { %1930 = vmatprep.subr.bf16.mxu0 %v2709_v56  ;;  %v2796_v56 = vld [vmem:[#allocation7 + $0x20c] ss:$16 sps:$4 sm:$0xff]  }
 0x151   :  { %1970 = vmatpush2.bf16.msra.mxu1 %v2704_v57  ;;  %v2791_v57 = vld [vmem:[#allocation7 + $0x8] ss:$16 sps:$4 sm:$0xff]  }
 0x152   :  { %1971 = vmatprep.subr.bf16.mxu1 %v2712_v58  ;;  %v2799_v58 = vld [vmem:[#allocation7 + $0x1ec] ss:$16 sps:$4 sm:$0xff]  }
 0x153   :  { %1931 = vmatpush2.bf16.msra.mxu0 %v2707_v59  ;;  %v2794_v59 = vld [vmem:[#allocation7 + $0x208] ss:$16 sps:$4 sm:$0xff]  }
 0x154   :  { %1932 = vmatprep.subr.bf16.mxu0 %v2715_v60  ;;  %v2802_v60 = vld [vmem:[#allocation7 + $0x3ec] ss:$16 sps:$4 sm:$0xff]  }
 0x155   :  { %1972 = vmatpush2.bf16.msra.mxu1 %v2710_v6  ;;  %v2797_v6 = vld [vmem:[#allocation7 + $0x1e8] ss:$16 sps:$4 sm:$0xff]  }
 0x156   :  { %1973 = vmatprep.subr.bf16.mxu1 %v2718_v62  ;;  %v2805_v62 = vld [vmem:[#allocation7 + $0x1cc] ss:$16 sps:$4 sm:$0xff]  }
 0x157   :  { %1933 = vmatpush2.bf16.msra.mxu0 %v2713_v63  ;;  %v2800_v63 = vld [vmem:[#allocation7 + $0x3e8] ss:$16 sps:$4 sm:$0xff]  }
 0x158   :  { %1934 = vmatprep.subr.bf16.mxu0 %v2721_v1  ;;  %v2808_v1 = vld [vmem:[#allocation7 + $0x3cc] ss:$16 sps:$4 sm:$0xff]  }
 0x159   :  { %1974 = vmatpush2.bf16.msra.mxu1 %v2716_v4  ;;  %v2803_v4 = vld [vmem:[#allocation7 + $0x1c8] ss:$16 sps:$4 sm:$0xff]  }
 0x15a   :  { %1975 = vmatprep.subr.bf16.mxu1 %v2724_v7  ;;  %v2811_v7 = vld [vmem:[#allocation7 + $0x1ac] ss:$16 sps:$4 sm:$0xff]  }
 0x15b   :  { %1935 = vmatpush2.bf16.msra.mxu0 %v2719_v8  ;;  %v2806_v8 = vld [vmem:[#allocation7 + $0x3c8] ss:$16 sps:$4 sm:$0xff]  }
 0x15c   :  { %1936 = vmatprep.subr.bf16.mxu0 %v2727_v49  ;;  %v2814_v49 = vld [vmem:[#allocation7 + $0x3ac] ss:$16 sps:$4 sm:$0xff]  }
 0x15d   :  { %1976 = vmatpush2.bf16.msra.mxu1 %v2722_v9  ;;  %v2809_v9 = vld [vmem:[#allocation7 + $0x1a8] ss:$16 sps:$4 sm:$0xff]  }
 0x15e   :  { %1977 = vmatprep.subr.bf16.mxu1 %v2730_v11  ;;  %v2817_v11 = vld [vmem:[#allocation7 + $0x18c] ss:$16 sps:$4 sm:$0xff]  }
 0x15f   :  { %1937 = vmatpush2.bf16.msra.mxu0 %v2725_v12  ;;  %v2812_v12 = vld [vmem:[#allocation7 + $0x3a8] ss:$16 sps:$4 sm:$0xff]  }
 0x160   :  { %1938 = vmatprep.subr.bf16.mxu0 %v2733_v14  ;;  %v2820_v14 = vld [vmem:[#allocation7 + $0x38c] ss:$16 sps:$4 sm:$0xff]  }
 0x161   :  { %1978 = vmatpush2.bf16.msra.mxu1 %v2728_v15  ;;  %v2815_v15 = vld [vmem:[#allocation7 + $0x188] ss:$16 sps:$4 sm:$0xff]  }
 0x162   :  { %1979 = vmatprep.subr.bf16.mxu1 %v2736_v16  ;;  %v2823_v16 = vld [vmem:[#allocation7 + $0x16c] ss:$16 sps:$4 sm:$0xff]  }
 0x163   :  { %1939 = vmatpush2.bf16.msra.mxu0 %v2731_v17  ;;  %v2818_v17 = vld [vmem:[#allocation7 + $0x388] ss:$16 sps:$4 sm:$0xff]  }
 0x164   :  { %1940 = vmatprep.subr.bf16.mxu0 %v2739_v18  ;;  %v2826_v18 = vld [vmem:[#allocation7 + $0x36c] ss:$16 sps:$4 sm:$0xff]  }
 0x165   :  { %1980 = vmatpush2.bf16.msra.mxu1 %v2734_v19  ;;  %v2821_v19 = vld [vmem:[#allocation7 + $0x168] ss:$16 sps:$4 sm:$0xff]  }
 0x166   :  { %1981 = vmatprep.subr.bf16.mxu1 %v2742_v20  ;;  %v2829_v20 = vld [vmem:[#allocation7 + $0x14c] ss:$16 sps:$4 sm:$0xff]  }
 0x167   :  { %1941 = vmatpush2.bf16.msra.mxu0 %v2737_v21  ;;  %v2824_v21 = vld [vmem:[#allocation7 + $0x368] ss:$16 sps:$4 sm:$0xff]  }
 0x168   :  { %1942 = vmatprep.subr.bf16.mxu0 %v2745_v23  ;;  %v2832_v23 = vld [vmem:[#allocation7 + $0x34c] ss:$16 sps:$4 sm:$0xff]  }
 0x169   :  { %1982 = vmatpush2.bf16.msra.mxu1 %v2740_v24  ;;  %v2827_v24 = vld [vmem:[#allocation7 + $0x148] ss:$16 sps:$4 sm:$0xff]  }
 0x16a   :  { %1983 = vmatprep.subr.bf16.mxu1 %v2748_v26  ;;  %v2835_v26 = vld [vmem:[#allocation7 + $0x12c] ss:$16 sps:$4 sm:$0xff]  }
 0x16b   :  { %1943 = vmatpush2.bf16.msra.mxu0 %v2743_v27  ;;  %v2830_v27 = vld [vmem:[#allocation7 + $0x348] ss:$16 sps:$4 sm:$0xff]  }
 0x16c   :  { %1994 = vmatprep.subr.bf16.mxu0 %v2751_v28  ;;  %v2838_v28 = vld [vmem:[#allocation7 + $0x32c] ss:$16 sps:$4 sm:$0xff]  }
 0x16d   :  { %1984 = vmatpush2.bf16.msra.mxu1 %v2746_v29  ;;  %v2833_v29 = vld [vmem:[#allocation7 + $0x128] ss:$16 sps:$4 sm:$0xff]  }
 0x16e   :  { %1945 = vmatmul.mubr.bf16.vlgmr.msra.gmra.mxu0 %v3071_v61  ;;  %2035 = vmatprep.subr.bf16.mxu1 %v2754_v30  ;;  %v2841_v30 = vld [vmem:[#allocation7 + $0x10c] ss:$16 sps:$4 sm:$0xff]  }
 0x16f   :  { %1995 = vmatpush1.bf16.msra.mxu0 %v2749_v31  ;;  %2026 = vmatprep.mubr.bf16.mxu0 %v3061_v22  ;;  %v2767_v22 = vld [vmem:[#allocation7 + $0x88] ss:$16 sps:$4 sm:$0xff]  }
 0x170   :  { %1986 = vmatmul.mubr.bf16.vlgmr.msra.gmra.mxu1 %v3076_v34  ;;  %1996 = vmatprep.subr.bf16.mxu0 %v2757_v32  ;;  %v2836_v31 = vld [vmem:[#allocation7 + $0x328] ss:$16 sps:$4 sm:$0xff]   ;;  %v2844_v32 = vld [vmem:[#allocation7 + $0x30c] ss:$16 sps:$4 sm:$0xff]  }
 0x171   :  { %2036 = vmatpush1.bf16.msra.mxu1 %v2752_v33  ;;  %2067 = vmatprep.mubr.bf16.mxu1 %v3063_v25  ;;  %v2773_v25 = vld [vmem:[#allocation7 + $0x68] ss:$16 sps:$4 sm:$0xff]  }
 0x172   :  { %2037 = vmatprep.subr.bf16.mxu1 %v2760_v0  ;;  %v2839_v33 = vld [vmem:[#allocation7 + $0x108] ss:$16 sps:$4 sm:$0xff]  }
 0x173   :  { %1997 = vmatpush1.bf16.msra.mxu0 %v2755_v35  ;;  %v2842_v0 = vld [vmem:[#allocation7 + $0x308] ss:$16 sps:$4 sm:$0xff]  }
 0x174   :  { %1998 = vmatprep.subr.bf16.mxu0 %v2763_v10 }
 0x175   :  { %2038 = vmatpush1.bf16.msra.mxu1 %v2758_v36 }
 0x176   :  { %2039 = vmatprep.subr.bf16.mxu1 %v2766_v37 }
 0x177   :  { %1999 = vmatpush1.bf16.msra.mxu0 %v2761_v38 }
 0x178   :  { %2000 = vmatprep.subr.bf16.mxu0 %v2769_v13 }
 0x179   :  { %2040 = vmatpush1.bf16.msra.mxu1 %v2764_v39 }
 0x17a   :  { %2041 = vmatprep.subr.bf16.mxu1 %v2772_v40 }
 0x17b   :  { %2001 = vmatpush1.bf16.msra.mxu0 %v2767_v22 }
 0x17c   :  { %2002 = vmatprep.subr.bf16.mxu0 %v2775_v41 }
 0x17d   :  { %2042 = vmatpush1.bf16.msra.mxu1 %v2770_v42 }
 0x17e   :  { %2043 = vmatprep.subr.bf16.mxu1 %v2778_v43 }
 0x17f   :  { %2003 = vmatpush1.bf16.msra.mxu0 %v2773_v25 }
 0x180   :  { %2004 = vmatprep.subr.bf16.mxu0 %v2781_v44 }
 0x181   :  { %2044 = vmatpush1.bf16.msra.mxu1 %v2776_v45 }
 0x182   :  { %2045 = vmatprep.subr.bf16.mxu1 %v2784_v46 }
 0x183   :  { %2005 = vmatpush1.bf16.msra.mxu0 %v2779_v47 }
 0x184   :  { %2006 = vmatprep.subr.bf16.mxu0 %v2787_v48 }
 0x185   :  { %2046 = vmatpush1.bf16.msra.mxu1 %v2782_v50 }
 0x186   :  { %2047 = vmatprep.subr.bf16.mxu1 %v2790_v51  ;;  %v2076_v51 = vld [vmem:[%s3103_s3] sm:$0xf]  ;;  %s2963_s3 = smov [#allocation8]  }
 0x187   :  { %2007 = vmatpush1.bf16.msra.mxu0 %v2785_v53  ;;  %v2084_v53 = vsub.s32 1, %v2998_v3  ;;  %s2183_s5 = sshll.u32 %s2963_s3, 4  ;;  %s2184_s5 = int_to_ptr.vmem [resolvable:$true] %s2183_s5 }
 0x188   :  { %2008 = vmatprep.subr.bf16.mxu0 %v2793_v54  ;;  %s2930_s6 = scalar_lea.vmem %s2184_s5, 128  ;;  %p2935_p2 = scmp.lt.s32.totalorder %s2184_s5, %s2184_s5 }
 0x189   :  { %2048 = vmatpush1.bf16.msra.mxu1 %v2788_v55  ;;  %p2931_p1 = scmp.ne.s32.totalorder %s2184_s5, %s2930_s6  ;;  %p2936_p3 = scmp.lt.s32.totalorder %s2930_s6, %s2930_s6 }
 0x18a   :  { %2049 = vmatprep.subr.bf16.mxu1 %v2796_v56 }
 0x18b   :  { %2009 = vmatpush1.bf16.msra.mxu0 %v2791_v57  ;;  %p2937_p4 = por %p2936_p3, %p2935_p2 }
 0x18c   :  { %2010 = vmatprep.subr.bf16.mxu0 %v2799_v58 }
 0x18d   :  { %2050 = vmatpush1.bf16.msra.mxu1 %v2794_v59  ;;  %p2938_p5 = pnand %p2937_p4, %p2931_p1 }
 0x18e   :  { %2051 = vmatprep.subr.bf16.mxu1 %v2802_v60 }
 0x18f   :  { %2011 = vmatpush2.bf16.msra.mxu0 %v2797_v6  ;;  %v2085_v6 = vrot.slane %v2076_v51, %v2084_v53 }
 0x190   :  { %2012 = vmatprep.subr.bf16.mxu0 %v2805_v62 }
 0x191   :  { %2052 = vmatpush2.bf16.msra.mxu1 %v2800_v63 }
 0x192   :  { %2053 = vmatprep.subr.bf16.mxu1 %v2808_v1 }
 0x193   :  { %2013 = vmatpush2.bf16.msra.mxu0 %v2803_v4 }
 0x194   :  { %2014 = vmatprep.subr.bf16.mxu0 %v2811_v7 }
 0x195   :  { %2054 = vmatpush2.bf16.msra.mxu1 %v2806_v8 }
 0x196   :  { %2055 = vmatprep.subr.bf16.mxu1 %v2814_v49 }
 0x197   :  { %2015 = vmatpush2.bf16.msra.mxu0 %v2809_v9 }
 0x198   :  { %2016 = vmatprep.subr.bf16.mxu0 %v2817_v11 }
 0x199   :  { %2056 = vmatpush2.bf16.msra.mxu1 %v2812_v12 }
 0x19a   :  { %2057 = vmatprep.subr.bf16.mxu1 %v2820_v14 }
 0x19b   :  { %2017 = vmatpush2.bf16.msra.mxu0 %v2815_v15 }
 0x19c   :  { %2018 = vmatprep.subr.bf16.mxu0 %v2823_v16 }
 0x19d   :  { %2058 = vmatpush2.bf16.msra.mxu1 %v2818_v17 }
 0x19e   :  { %2059 = vmatprep.subr.bf16.mxu1 %v2826_v18  ;;  %v2126_v18 = vsub.f32 %v3046_v2, %v3024_v52 }
 0x19f   :  { %2019 = vmatpush2.bf16.msra.mxu0 %v2821_v19 }
 0x1a0   :  { %2020 = vmatprep.subr.bf16.mxu0 %v2829_v20  ;;  %v2135_v19 = vrot.slane %v2126_v18, %v3001_v5 }
 0x1a1   :  { %2060 = vmatpush2.bf16.msra.mxu1 %v2824_v21 }
 0x1a2   :  { %2061 = vmatprep.subr.bf16.mxu1 %v2832_v23  ;;  %v2143_v21 = vcombine.high %v2135_v19, %v2135_v19 }
 0x1a3   :  { %2021 = vmatpush2.bf16.msra.mxu0 %v2827_v24 }
 0x1a4   :  { %2022 = vmatprep.subr.bf16.mxu0 %v2835_v26 }
 0x1a5   :  { %2062 = vmatpush2.bf16.msra.mxu1 %v2830_v27 }
 0x1a6   :  { %2063 = vmatprep.subr.bf16.mxu1 %v2838_v28  ;;  %v2088_v28 = vsub.s32 2, %v2998_v3 }
 0x1a7   :  { %2023 = vmatpush2.bf16.msra.mxu0 %v2833_v29  ;;  %v2092_v29 = vsub.s32 3, %v2998_v3 }
 0x1a8   :  { %2024 = vmatprep.subr.bf16.mxu0 %v2841_v30 }
 0x1a9   :  { %2064 = vmatpush2.bf16.msra.mxu1 %v2836_v31  ;;  %v2093_v2 = vrot.slane %v2076_v51, %v2092_v29 }
 0x1aa   :  { %2065 = vmatprep.subr.bf16.mxu1 %v2844_v32  ;;  %v2089_v32 = vrot.slane %v2076_v51, %v2088_v28 }
 0x1ab   :  { %2025 = vmatpush2.bf16.msra.mxu0 %v2839_v33 }
 0x1ad   :  { %2066 = vmatpush2.bf16.msra.mxu1 %v2842_v0 }
 0x1ae   :  { %2027 = vmatmul.mubr.bf16.vlgmr.msra.gmra.mxu0 %v3071_v61  ;;  %v1142_v35 = vpop.f32.mrf.mxu0 }
 0x1b0   :  { %2068 = vmatmul.mubr.bf16.vlgmr.msra.gmra.mxu1 %v3076_v34  ;;  %v1144_v10 = vpop.f32.mrf.mxu0  ;;  %v1183_v36 = vpop.f32.mrf.mxu1  ;;  %v2080_v34 = vsub.s32 0, %v2998_v3 }
 0x1b1   :  { %v1184_v37 = vadd.f32 %v1183_v36, %v1142_v35 }
 0x1b2   :  { %v1146_v38 = vpop.f32.mrf.mxu0  ;;  %v1185_v13 = vpop.f32.mrf.mxu1  ;;  %v2081_v56 = vrot.slane %v2076_v51, %v2080_v34 }
 0x1b3   :  { %v1186_v39 = vadd.f32 %v1185_v13, %v1144_v10 }
 0x1b4   :  { %v1147_v40 = vpop.f32.mrf.mxu0  ;;  %v1187_v22 = vpop.f32.mrf.mxu1 }
 0x1b6   :  { %v1188_v41 = vpop.f32.mrf.mxu1 }
 0x1ee   :  { %v1224_v42 = vpop.f32.mrf.mxu0 }
 0x1f0   :  { %v1226_v43 = vpop.f32.mrf.mxu0  ;;  %v1265_v25 = vpop.f32.mrf.mxu1 }
 0x1f1   :  { %v1266_v44 = vadd.f32 %v1265_v25, %v1224_v42 }
 0x1f2   :  { %v1228_v45 = vpop.f32.mrf.mxu0  ;;  %v1267_v46 = vpop.f32.mrf.mxu1 }
 0x1f3   :  { %v1268_v47 = vadd.f32 %v1267_v46, %v1226_v43  ;;  %v2128_v46 = vcombine.high %v2126_v18, %v2126_v18 }
 0x1f4   :  { %v1229_v61 = vpop.f32.mrf.mxu0  ;;  %v1269_v48 = vpop.f32.mrf.mxu1 }
 0x1f6   :  { %v1270_v50 = vpop.f32.mrf.mxu1 }
 0x22e   :  { %v1946_v54 = vpop.f32.mrf.mxu0 }
 0x22f   :  { %v1947_v55 = vadd.f32 %v1946_v54, %v1184_v37 }
 0x230   :  { %v1948_v57 = vpop.f32.mrf.mxu0  ;;  %v1987_v58 = vpop.f32.mrf.mxu1 }
 0x231   :  { %v1949_v59 = vadd.f32 %v1948_v57, %v1186_v39  ;;  %v1988_v60 = vadd.f32 %v1987_v58, %v1947_v55 }
 0x232   :  { %v1950_v62 = vpop.f32.mrf.mxu0  ;;  %v1989_v63 = vpop.f32.mrf.mxu1 }
 0x233   :  { %v2098_v1 = vadd.f32 %v2081_v56, %v1988_v60  ;;  %v1990_v4 = vadd.f32 %v1989_v63, %v1949_v59 }
 0x234   :  { %v1951_v7 = vpop.f32.mrf.mxu0  ;;  %v1991_v8 = vpop.f32.mrf.mxu1 }
 0x235   :  { %v2449_v49 = vmul.f32 -1.442695, %v2098_v1  ;;  %v2099_v9 = vadd.f32 %v2085_v6, %v1990_v4 }
 0x236   :  { %v1992_v11 = vpop.f32.mrf.mxu1 }
 0x237   :  { %2853 = vpow2.f32 %v2449_v49  ;;  %v2450_v12 = vmul.f32 -1.442695, %v2099_v9 }
 0x239   :  { %2855 = vpow2.f32 %v2450_v12 }
 0x244   :  { %v2854_v14 = vpop.eup %2853 }
 0x245   :  { %v2114_v15 = vadd.f32 1.0, %v2854_v14 }
 0x246   :  { %v2856_v16 = vpop.eup %2855 }
 0x247   :  { %2857 = vrcp.f32 %v2114_v15  ;;  %v2115_v17 = vadd.f32 1.0, %v2856_v16 }
 0x249   :  { %2859 = vrcp.f32 %v2115_v17 }
 0x254   :  { %v2858_v20 = vpop.eup %2857 }
 0x255   :  { %v2149_v23 = vmul.f32 %v2858_v20, %v2135_v19 }
 0x256   :  { %v2860_v24 = vpop.eup %2859 }
 0x257   :  { %v2150_v26 = vmul.f32 %v2860_v24, %v2143_v21 }
 0x259   :  { %v2157_v27 = vcombine.low %v2149_v23, %v2150_v26 }
 0x25b   :  { %v2165_v54 = vrot.slane %v2157_v27, %v3001_v5 }
 0x26e   :  { %v2028_v30 = vpop.f32.mrf.mxu0 }
 0x26f   :  { %v2029_v31 = vadd.f32 %v2028_v30, %v1266_v44 }
 0x270   :  { %v2030_v33 = vpop.f32.mrf.mxu0  ;;  %v2069_v0 = vpop.f32.mrf.mxu1 }
 0x271   :  { %v2031_v35 = vadd.f32 %v2030_v33, %v1268_v47  ;;  %v2070_v10 = vadd.f32 %v2069_v0, %v2029_v31  ;;  %v2142_v47 = vrot.slane %v2128_v46, %v3001_v5 }
 0x272   :  { %v2032_v36 = vpop.f32.mrf.mxu0  ;;  %v2071_v37 = vpop.f32.mrf.mxu1 }
 0x273   :  { %v2100_v38 = vadd.f32 %v2089_v32, %v2070_v10  ;;  %v2072_v13 = vadd.f32 %v2071_v37, %v2031_v35  ;;  %v2144_v48 = vcombine.high %v2142_v47, %v2142_v47 }
 0x274   :  { %v2033_v39 = vpop.f32.mrf.mxu0  ;;  %v2073_v40 = vpop.f32.mrf.mxu1 }
 0x275   :  { %v2451_v22 = vmul.f32 -1.442695, %v2100_v38  ;;  %v2101_v41 = vadd.f32 %v2093_v2, %v2072_v13 }
 0x276   :  { %v2074_v42 = vpop.f32.mrf.mxu1 }
 0x277   :  { %2861 = vpow2.f32 %v2451_v22  ;;  %v2452_v43 = vmul.f32 -1.442695, %v2101_v41 }
 0x279   :  { %2863 = vpow2.f32 %v2452_v43 }
 0x284   :  { %v2862_v3 = vpop.eup %2861 }
 0x285   :  { %v2116_v25 = vadd.f32 1.0, %v2862_v3 }
 0x286   :  { %v2864_v44 = vpop.eup %2863 }
 0x287   :  { %2865 = vrcp.f32 %v2116_v25  ;;  %v2117_v45 = vadd.f32 1.0, %v2864_v44 }
 0x289   :  { %2867 = vrcp.f32 %v2117_v45 }
 0x294   :  { %v2866_v61 = vpop.eup %2865 }
 0x295   :  { %v2151_v50 = vmul.f32 %v2866_v61, %v2142_v47 }
 0x296   :  { %v2868_v34 = vpop.eup %2867 }
 0x297   :  { %v2152_v51 = vmul.f32 %v2868_v34, %v2144_v48 }
 0x299   :  { %v2158_v53 = vcombine.low %v2151_v50, %v2152_v51 }
 0x29b   :  { %v2172_v55 = vrot.slane %v2158_v53, %v3001_v5 }
 0x29d   :  { %v2173_v56 = vcombine.low %v2165_v54, %v2172_v55 }
 0x29f   :  { %v2175_v57 = vadd.f32 %v2173_v56, %v3024_v52 }
 0x2a1   :  { %2176 = vst [vmem:[#allocation8] sm:$0xff] %v2175_v57 }
 0x2a2   :  { %2941 = shalt.err (!%p2938_p5)
}
 0x2a3   :  { %2186 = dma.vmem_to_hbm [thread:$0]  %s2184_s5, 128, %s3104_s4, [#allocation4]  }
 0x2a4   :  { %2954 = dma.done.wait [#allocation4], 128  }
 0x2a5   :  { %2955 = vsyncadd [#allocation4], 4294967168 }
 0x2a6   :  { %2190 = vsyncpa [#allocation3], 1 }
 0x2a7   :  { %2191 = vsyncpa [#allocation6], 1 }
 0x2a8   :  { %2192 = vsyncpa [#allocation4], 1 }

</bundles_post_ra>
